<compile_context>
chip_gen: v6e
topology: v6e:2x2x1
jax: 0.10.0
libtpu: 0.0.40
codegen_flags: <defaults>
</compile_context>

<pallas_src>
import functools

import jax
import jax.numpy as jnp
from jax.experimental import pallas as pl
from jax.experimental.pallas import tpu as pltpu


def _vmem_limit_bytes():
    """Scoped-VMEM budget per generation (v7x: 64 MiB physical; v5e/v6e: 128 MiB)."""
    try:
        kind = jax.devices()[0].device_kind.lower()
    except Exception:
        kind = ""
    if "v7" in kind or "7x" in kind:
        return 44 * 1024 * 1024
    return 96 * 1024 * 1024


def _resident_spec(block_shape, index_map):
    """BlockSpec for a constant-index (resident) block.

    Constant-index blocks are double-buffered by default; Buffered(1) halves
    their VMEM footprint. Fall back to a plain spec on older jax versions.
    """
    try:
        return pl.BlockSpec(block_shape, index_map,
                            pipeline_mode=pl.Buffered(buffer_count=1))
    except Exception:  # pl.Buffered / pipeline_mode not available
        return pl.BlockSpec(block_shape, index_map)


def _pick_block(n, cap, min_steps=2):
    """Largest row block that divides n, is a multiple of 8 (or == n), fits
    `cap`, and (when possible) leaves >= min_steps grid steps (v7x megacore)."""
    cap = max(1, min(int(cap), n))
    candidates = [n] + [d for d in range(8, n, 8) if n % d == 0]
    fitting = [c for c in candidates if c <= cap] or [min(candidates)]
    multi = [c for c in fitting if n // c >= min_steps]
    return max(multi) if multi else max(fitting)


def _mapper_block_cap(s, d_out, d_proj, vmem_bytes):
    """Batch rows fitting the VMEM budget (double-buffered tiles).

    Includes the mask block's hidden lane padding: a (.., S, 1) block pads its
    last dim to 128 lanes in VMEM.
    """
    per_row = 2 * (s * d_out * 2        # hidden tile, bf16, x2 buffers
                   + s * 128 * 2        # mask tile padded to 128 lanes, bf16
                   + d_proj * 4)        # f32 output tile, x2 buffers
    fixed = d_out * d_proj * 2 + 8 * d_proj * 4   # resident weight + bias
    budget = (vmem_bytes // 2) - fixed            # headroom for temporaries
    return max(8, budget // per_row)


def _loss_block_cap(b, d, vmem_bytes):
    """Anchor rows fitting the VMEM budget for the loss kernel."""
    fixed = b * d * 4 + 8 * b * 4       # resident pos (f32, single buffer) + idx row
    per_row = (2 * (d * 4               # anchor tile, x2 buffers
                    + d * 4             # matching pos-diag tile, x2 buffers
                    + 128 * 4           # idx column (lane-padded)
                    + 128 * 4)          # loss output (lane-padded)
               + 2 * b * 4)             # (TBL, B) logits/sim live values
    budget = (vmem_bytes // 2) - fixed
    return max(8, budget // per_row)


# ----------------------------------------------------------------------------
# Kernel 1: SMT5MapperModel.forward (batch-tiled)
#   masked mean-pool over sequence -> Linear(d_out, d_proj) -> L2 normalize
# ----------------------------------------------------------------------------
def mapper_kernel(hid_ref, mask_ref, w_ref, b_ref, out_ref):
    # hid_ref : (TB, S, D_out) bf16     mask_ref : (TB, S, 1) bf16 (0/1)
    # w_ref   : (D_out, D_proj) bf16    b_ref    : (1, D_proj) f32
    # Masked multiply in bf16 (exact since mask is 0/1); accumulate the
    # sequence reduction in f32 without materializing an f32 copy of the tile.
    masked = hid_ref[...] * mask_ref[...]
    sum_emb = jnp.sum(masked, axis=1, dtype=jnp.float32)             # (TB, D_out)
    sum_mask = jnp.maximum(
        jnp.sum(mask_ref[...].astype(jnp.float32), axis=1), 1e-9)    # clamp(min=1e-9)
    pooled = sum_emb / sum_mask                                      # (TB, D_out)

    # bf16 x bf16 with f32 accumulation: MXU-native path on v5e/v6e/v7x.
    x = jnp.dot(pooled.astype(jnp.bfloat16), w_ref[...],
                preferred_element_type=jnp.float32) + b_ref[...]

    # F.normalize(p=2, dim=1, eps=1e-12)  ==  x * rsqrt(max(sum(x^2), eps^2))
    ss = jnp.sum(x * x, axis=-1, keepdims=True)
    out_ref[...] = x * jax.lax.rsqrt(jnp.maximum(ss, 1e-24))


def run_mapper(hidden_bf16, mask3, w_bf16, b):
    b_tot, s, d_out = hidden_bf16.shape
    d_proj = w_bf16.shape[1]
    vmem_limit = _vmem_limit_bytes()
    block_b = _pick_block(b_tot, _mapper_block_cap(s, d_out, d_proj, vmem_limit))
    grid = (pl.cdiv(b_tot, block_b),)
    return pl.pallas_call(
        mapper_kernel,
        out_shape=jax.ShapeDtypeStruct((b_tot, d_proj), jnp.float32),
        grid_spec=pltpu.PrefetchScalarGridSpec(
            num_scalar_prefetch=0,
            grid=grid,
            in_specs=[
                pl.BlockSpec((block_b, s, d_out), lambda i: (i, 0, 0)),
                pl.BlockSpec((block_b, s, 1), lambda i: (i, 0, 0)),
                _resident_spec((d_out, d_proj), lambda i: (0, 0)),   # weight
                _resident_spec((1, d_proj), lambda i: (0, 0)),       # bias
            ],
            out_specs=pl.BlockSpec((block_b, d_proj), lambda i: (i, 0)),
        ),
        compiler_params=pltpu.CompilerParams(
            dimension_semantics=("parallel",),
            vmem_limit_bytes=vmem_limit,
        ),
    )(hidden_bf16, mask3, w_bf16, b)


# ----------------------------------------------------------------------------
# Kernel 2: contrastive loss of SMT5CLModel.forward ('query'/'answer' branch)
#   sim = exp(anchor @ pos^T / temp)
#   cross[i,j] = (idx[i] == idx[j]);  neg_mask = 1 - (cross - eye)
#   loss = -log( (sim*eye).sum(-1) / (sim*neg_mask).sum(-1) )     -> (B, 1)
# Row-tiled: each grid step processes a (TBL, D) anchor block against the
# full pos matrix (resident, single-buffered); diagonal term comes from the
# matching pos block directly. Max-subtraction keeps exp/log stable.
# ----------------------------------------------------------------------------
def make_loss_kernel(temp):
    inv_temp = 1.0 / float(temp)

    def loss_kernel(a_ref, p_full_ref, p_diag_ref, idx_col_ref, idx_row_ref,
                    loss_ref):
        a = a_ref[...]                  # (TBL, D) f32
        p_full = p_full_ref[...]        # (B,  D) f32 (resident)
        p_diag = p_diag_ref[...]        # (TBL, D) rows matching this tile

        # Contract the last dims of both operands: no transpose/relayout of the
        # resident pos block, MXU-preferred layout.
        logits = jax.lax.dot_general(
            a, p_full, dimension_numbers=(((1,), (1,)), ((), ())),
            preferred_element_type=jnp.float32) * inv_temp            # (TBL, B)
        diag_logit = jnp.sum(a * p_diag, axis=-1, keepdims=True) * inv_temp

        m = jnp.max(logits, axis=-1, keepdims=True)       # shared row max
        sim = jnp.exp(logits - m)                         # (TBL, B)
        self_pos = jnp.exp(diag_logit - m)                # (TBL, 1)

        cross = (idx_col_ref[...] == idx_row_ref[...]).astype(jnp.float32)
        # sum(sim * (1 - (cross - eye))) = sum(sim) - sum(sim*cross) + diag
        ib_neg = (jnp.sum(sim, axis=-1, keepdims=True)
                  - jnp.sum(sim * cross, axis=-1, keepdims=True)
                  + self_pos)

        # -log(self_pos / ib_neg) = log(ib_neg) - log(self_pos)
        loss_ref[...] = jnp.log(ib_neg) - (diag_logit - m)

    return loss_kernel


def run_loss(anchor, pos, idx, temp):
    b, d = anchor.shape
    idx_col = idx.reshape(b, 1).astype(jnp.int32)
    idx_row = idx.reshape(1, b).astype(jnp.int32)
    vmem_limit = _vmem_limit_bytes()
    block_rows = _pick_block(b, _loss_block_cap(b, d, vmem_limit))
    grid = (pl.cdiv(b, block_rows),)
    return pl.pallas_call(
        make_loss_kernel(temp),
        out_shape=jax.ShapeDtypeStruct((b, 1), jnp.float32),
        grid_spec=pltpu.PrefetchScalarGridSpec(
            num_scalar_prefetch=0,
            grid=grid,
            in_specs=[
                pl.BlockSpec((block_rows, d), lambda i: (i, 0)),   # anchor tile
                _resident_spec((b, d), lambda i: (0, 0)),          # pos, resident
                pl.BlockSpec((block_rows, d), lambda i: (i, 0)),   # pos diag tile
                pl.BlockSpec((block_rows, 1), lambda i: (i, 0)),   # idx column
                _resident_spec((1, b), lambda i: (0, 0)),          # idx row, resident
            ],
            out_specs=pl.BlockSpec((block_rows, 1), lambda i: (i, 0)),
        ),
        compiler_params=pltpu.CompilerParams(
            dimension_semantics=("parallel",),
            vmem_limit_bytes=vmem_limit,
        ),
    )(anchor, pos, pos, idx_col, idx_row)


# ----------------------------------------------------------------------------
# SMT5CLModel forward ('query_input_ids' branch, encoder outputs given).
# No wrapper-side concat: each encoder output gets its own mapper launch and
# is consumed directly in bf16 (no extra HBM pass over the big tensors).
# ----------------------------------------------------------------------------
@functools.partial(jax.jit, static_argnames=("temp",))
def smt5_cl_forward(params, query_hidden, query_mask, ans_hidden, ans_mask,
                    idx, temp):
    w_bf16 = params["w"].astype(jnp.bfloat16)
    b_f32 = params["b"].astype(jnp.float32)
    q_mask3 = query_mask.astype(jnp.bfloat16)[:, :, None]
    a_mask3 = ans_mask.astype(jnp.bfloat16)[:, :, None]

    anchor_out = run_mapper(query_hidden.astype(jnp.bfloat16), q_mask3, w_bf16, b_f32)
    pos_out = run_mapper(ans_hidden.astype(jnp.bfloat16), a_mask3, w_bf16, b_f32)

    loss = run_loss(anchor_out, pos_out, idx, temp)
    return loss, anchor_out, pos_out


# ----------------------------------------------------------------------------
# Pure-JAX reference (mirrors the torch module; same bf16-cast inputs/weight)
# ----------------------------------------------------------------------------
def reference(params, qh, qm, ah, am, idx, temp):
    w = params["w"].astype(jnp.bfloat16)
    b = params["b"].astype(jnp.float32)

    def mapper(h, mask):
        h = h.astype(jnp.bfloat16).astype(jnp.float32)
        me = mask[:, :, None].astype(jnp.float32)
        s = jnp.sum(h * me, axis=1)
        sm = jnp.maximum(jnp.sum(me, axis=1), 1e-9)
        pooled = (s / sm).astype(jnp.bfloat16)
        x = jnp.dot(pooled, w, preferred_element_type=jnp.float32) + b
        n = jnp.sqrt(jnp.sum(x * x, axis=-1, keepdims=True))
        return x / jnp.maximum(n, 1e-12)

    anchor, pos = mapper(qh, qm), mapper(ah, am)
    sim = jnp.exp(anchor @ pos.T / temp)
    cross = (idx[:, None] == idx[None, :]).astype(jnp.float32)
    eye = jnp.eye(anchor.shape[0], dtype=jnp.float32)
    neg_mask = 1.0 - (cross - eye)
    self_pos = jnp.sum(sim * eye, axis=-1, keepdims=True)
    ib_neg = jnp.sum(sim * neg_mask, axis=-1, keepdims=True)
    return -jnp.log(self_pos / ib_neg), anchor, pos


if __name__ == "__main__":
    # Small but hardware-friendly demo shapes: S multiple of 16 (bf16 sublane
    # packing), D_out multiple of 128, D_proj multiple of 256 (v6e/v7x MXU).
    B, S, D_OUT, D_PROJ = 16, 16, 128, 256
    TEMP = 0.05        # SMT5Config.temp analogue
    INIT_RANGE = 0.02  # SMT5Config.initializer_range analogue

    key = jax.random.PRNGKey(0)
    k1, k2, k3 = jax.random.split(key, 3)

    # Synthetic encoder last_hidden_states in bf16.
    # TODO(synk): real MT5EncoderModel not re-implemented; its outputs are inputs.
    query_hidden = jax.random.normal(k1, (B, S, D_OUT), jnp.float32).astype(jnp.bfloat16)
    ans_hidden = jax.random.normal(k2, (B, S, D_OUT), jnp.float32).astype(jnp.bfloat16)

    # Attention masks with varying valid lengths (0/1 floats).
    pos_ids = jnp.arange(S)[None, :]
    q_lens = (3 + (jnp.arange(B) % (S - 3)))[:, None]
    a_lens = (2 + ((jnp.arange(B) * 3) % (S - 2)))[:, None]
    query_mask = (pos_ids < q_lens).astype(jnp.float32)
    ans_mask = (pos_ids < a_lens).astype(jnp.float32)

    # idx: language/pair identifiers with duplicates (exercises cross mask).
    idx = (jnp.arange(B) // 2).astype(jnp.int32)

    # Mapper parameters: Linear(d_out, d_proj); weight stored pre-transposed
    # as (D_out, D_proj) == torch Linear.weight.T.
    params = {
        "w": INIT_RANGE * jax.random.normal(k3, (D_OUT, D_PROJ), jnp.float32),
        "b": jnp.zeros((1, D_PROJ), jnp.float32),
    }

    loss, anchor_out, pos_out = smt5_cl_forward(
        params, query_hidden, query_mask, ans_hidden, ans_mask, idx, TEMP)
    loss = jax.block_until_ready(loss)

    ref_loss, ref_anchor, ref_pos = reference(
        params, query_hidden, query_mask, ans_hidden, ans_mask, idx, TEMP)

    assert loss.shape == (B, 1)
    assert anchor_out.shape == (B, D_PROJ) and pos_out.shape == (B, D_PROJ)
    assert jnp.allclose(anchor_out, ref_anchor, rtol=2e-3, atol=1e-3)
    assert jnp.allclose(pos_out, ref_pos, rtol=2e-3, atol=1e-3)
    assert jnp.allclose(loss, ref_loss, rtol=1e-2, atol=1e-2), (loss, ref_loss)

    print("KERNEL_OK")
</pallas_src>

<mosaic_0001>
module attributes {stable_mosaic.version = 11 : i64} {
  func.func @mapper_kernel(%arg0: i32, %arg1: memref<8x16x128xbf16, #tpu.memory_space<vmem>>, %arg2: memref<8x16x1xbf16, #tpu.memory_space<vmem>>, %arg3: memref<128x256xbf16, #tpu.memory_space<vmem>>, %arg4: memref<1x256xf32, #tpu.memory_space<vmem>>, %arg5: memref<8x256xf32, #tpu.memory_space<vmem>>) attributes {dimension_semantics = [#tpu.dimension_semantics<parallel>], iteration_bounds = array<i64: 2>, scalar_prefetch = 0 : i64, scratch_operands = 0 : i64, tpu.core_type = #tpu.core_type<tc>, window_params = [{transform_indices = @transform_0, window_bounds = array<i64: 8, 16, 128>}, {transform_indices = @transform_1, window_bounds = array<i64: 8, 16, 1>}, {pipeline_mode = #tpu.pipeline_mode<synchronous>, transform_indices = @transform_2, window_bounds = array<i64: 128, 256>}, {pipeline_mode = #tpu.pipeline_mode<synchronous>, transform_indices = @transform_3, window_bounds = array<i64: 1, 256>}, {transform_indices = @transform_4, window_bounds = array<i64: 8, 256>}]} {
    %c0 = arith.constant 0 : index
    %c0_0 = arith.constant 0 : index
    %c0_1 = arith.constant 0 : index
    %0 = vector.load %arg1[%c0, %c0_0, %c0_1] : memref<8x16x128xbf16, #tpu.memory_space<vmem>>, vector<8x16x128xbf16>
    %c0_2 = arith.constant 0 : index
    %c0_3 = arith.constant 0 : index
    %c0_4 = arith.constant 0 : index
    %1 = vector.load %arg2[%c0_2, %c0_3, %c0_4] : memref<8x16x1xbf16, #tpu.memory_space<vmem>>, vector<8x16x1xbf16>
    %2 = vector.broadcast %1 : vector<8x16x1xbf16> to vector<8x16x128xbf16>
    %3 = arith.mulf %0, %2 : vector<8x16x128xbf16>
    %4 = arith.extf %3 : vector<8x16x128xbf16> to vector<8x16x128xf32>
    %cst = arith.constant dense<0.000000e+00> : vector<8x128xf32>
    %5 = vector.multi_reduction <add>, %4, %cst [1] : vector<8x16x128xf32> to vector<8x128xf32>
    %c0_5 = arith.constant 0 : index
    %c0_6 = arith.constant 0 : index
    %c0_7 = arith.constant 0 : index
    %6 = vector.load %arg2[%c0_5, %c0_6, %c0_7] : memref<8x16x1xbf16, #tpu.memory_space<vmem>>, vector<8x16x1xbf16>
    %7 = arith.extf %6 : vector<8x16x1xbf16> to vector<8x16x1xf32>
    %cst_8 = arith.constant dense<0.000000e+00> : vector<8x1xf32>
    %8 = vector.multi_reduction <add>, %7, %cst_8 [1] : vector<8x16x1xf32> to vector<8x1xf32>
    %cst_9 = arith.constant 9.99999971E-10 : f32
    %9 = vector.broadcast %cst_9 : f32 to vector<8x1xf32>
    %10 = arith.maximumf %8, %9 : vector<8x1xf32>
    %11 = vector.broadcast %10 : vector<8x1xf32> to vector<8x128xf32>
    %12 = arith.divf %5, %11 : vector<8x128xf32>
    %13 = arith.truncf %12 : vector<8x128xf32> to vector<8x128xbf16>
    %c0_10 = arith.constant 0 : index
    %c0_11 = arith.constant 0 : index
    %14 = vector.load %arg3[%c0_10, %c0_11] : memref<128x256xbf16, #tpu.memory_space<vmem>>, vector<128x256xbf16>
    %cst_12 = arith.constant dense<0.000000e+00> : vector<8x256xf32>
    %15 = tpu.matmul %13, %14, %cst_12 {dimension_numbers = #tpu.dot_dimension_numbers<[1], [0], [0], [1], [0, 0, 1, 1], [], []>} : vector<8x128xbf16>, vector<128x256xbf16>, vector<8x256xf32> -> vector<8x256xf32>
    %c0_13 = arith.constant 0 : index
    %c0_14 = arith.constant 0 : index
    %16 = vector.load %arg4[%c0_13, %c0_14] : memref<1x256xf32, #tpu.memory_space<vmem>>, vector<1x256xf32>
    %17 = vector.broadcast %16 : vector<1x256xf32> to vector<8x256xf32>
    %18 = arith.addf %15, %17 : vector<8x256xf32>
    %19 = arith.mulf %18, %18 : vector<8x256xf32>
    %cst_15 = arith.constant dense<0.000000e+00> : vector<8xf32>
    %20 = vector.multi_reduction <add>, %19, %cst_15 [1] : vector<8x256xf32> to vector<8xf32>
    %21 = vector.shape_cast %20 : vector<8xf32> to vector<8x1xf32>
    %cst_16 = arith.constant 1.000000e-24 : f32
    %22 = vector.broadcast %cst_16 : f32 to vector<8x1xf32>
    %23 = arith.maximumf %21, %22 : vector<8x1xf32>
    %24 = math.rsqrt %23 : vector<8x1xf32>
    %25 = vector.broadcast %24 : vector<8x1xf32> to vector<8x256xf32>
    %26 = arith.mulf %18, %25 : vector<8x256xf32>
    %c0_17 = arith.constant 0 : index
    %c0_18 = arith.constant 0 : index
    %27 = vector.load %arg5[%c0_17, %c0_18] : memref<8x256xf32, #tpu.memory_space<vmem>>, vector<8x256xf32>
    tpu.vector_store %arg5[%c0_17, %c0_18], %26 {strides = array<i32>} : memref<8x256xf32, #tpu.memory_space<vmem>>, vector<8x256xf32>,
    return
  }
  func.func @transform_0(%arg0: i32) -> (i32, i32, i32) {
    %c0_i32 = arith.constant 0 : i32
    %c0_i32_0 = arith.constant 0 : i32
    %c0_i32_1 = arith.constant 0 : i32
    return %arg0, %c0_i32, %c0_i32_0 : i32, i32, i32
  }
  func.func @transform_1(%arg0: i32) -> (i32, i32, i32) {
    %c0_i32 = arith.constant 0 : i32
    %c0_i32_0 = arith.constant 0 : i32
    %c0_i32_1 = arith.constant 0 : i32
    return %arg0, %c0_i32, %c0_i32_0 : i32, i32, i32
  }
  func.func @transform_2(%arg0: i32) -> (i32, i32) {
    %c0_i32 = arith.constant 0 : i32
    %c0_i32_0 = arith.constant 0 : i32
    %c0_i32_1 = arith.constant 0 : i32
    return %c0_i32, %c0_i32_0 : i32, i32
  }
  func.func @transform_3(%arg0: i32) -> (i32, i32) {
    %c0_i32 = arith.constant 0 : i32
    %c0_i32_0 = arith.constant 0 : i32
    %c0_i32_1 = arith.constant 0 : i32
    return %c0_i32, %c0_i32_0 : i32, i32
  }
  func.func @transform_4(%arg0: i32) -> (i32, i32) {
    %c0_i32 = arith.constant 0 : i32
    %c0_i32_0 = arith.constant 0 : i32
    return %arg0, %c0_i32 : i32, i32
  }
}

module attributes {stable_mosaic.version = 11 : i64} {
  func.func @loss_kernel(%arg0: i32, %arg1: memref<8x256xf32, #tpu.memory_space<vmem>>, %arg2: memref<16x256xf32, #tpu.memory_space<vmem>>, %arg3: memref<8x256xf32, #tpu.memory_space<vmem>>, %arg4: memref<8x1xi32, #tpu.memory_space<vmem>>, %arg5: memref<1x16xi32, #tpu.memory_space<vmem>>, %arg6: memref<8x1xf32, #tpu.memory_space<vmem>>) attributes {dimension_semantics = [#tpu.dimension_semantics<parallel>], iteration_bounds = array<i64: 2>, scalar_prefetch = 0 : i64, scratch_operands = 0 : i64, tpu.core_type = #tpu.core_type<tc>, window_params = [{transform_indices = @transform_0, window_bounds = array<i64: 8, 256>}, {pipeline_mode = #tpu.pipeline_mode<synchronous>, transform_indices = @transform_1, window_bounds = array<i64: 16, 256>}, {transform_indices = @transform_2, window_bounds = array<i64: 8, 256>}, {transform_indices = @transform_3, window_bounds = array<i64: 8, 1>}, {pipeline_mode = #tpu.pipeline_mode<synchronous>, transform_indices = @transform_4, window_bounds = array<i64: 1, 16>}, {transform_indices = @transform_5, window_bounds = array<i64: 8, 1>}]} {
    %c0 = arith.constant 0 : index
    %c0_0 = arith.constant 0 : index
    %0 = vector.load %arg1[%c0, %c0_0] : memref<8x256xf32, #tpu.memory_space<vmem>>, vector<8x256xf32>
    %c0_1 = arith.constant 0 : index
    %c0_2 = arith.constant 0 : index
    %1 = vector.load %arg2[%c0_1, %c0_2] : memref<16x256xf32, #tpu.memory_space<vmem>>, vector<16x256xf32>
    %c0_3 = arith.constant 0 : index
    %c0_4 = arith.constant 0 : index
    %2 = vector.load %arg3[%c0_3, %c0_4] : memref<8x256xf32, #tpu.memory_space<vmem>>, vector<8x256xf32>
    %cst = arith.constant dense<0.000000e+00> : vector<8x16xf32>
    %3 = tpu.matmul %0, %1, %cst {dimension_numbers = #tpu.dot_dimension_numbers<[1], [1], [0], [0], [0, 0, 1, 0], [], []>} : vector<8x256xf32>, vector<16x256xf32>, vector<8x16xf32> -> vector<8x16xf32>
    %cst_5 = arith.constant 2.000000e+01 : f32
    %4 = vector.broadcast %cst_5 : f32 to vector<8x16xf32>
    %5 = arith.mulf %3, %4 : vector<8x16xf32>
    %6 = arith.mulf %0, %2 : vector<8x256xf32>
    %cst_6 = arith.constant dense<0.000000e+00> : vector<8xf32>
    %7 = vector.multi_reduction <add>, %6, %cst_6 [1] : vector<8x256xf32> to vector<8xf32>
    %8 = vector.shape_cast %7 : vector<8xf32> to vector<8x1xf32>
    %cst_7 = arith.constant 2.000000e+01 : f32
    %9 = vector.broadcast %cst_7 : f32 to vector<8x1xf32>
    %10 = arith.mulf %8, %9 : vector<8x1xf32>
    %cst_8 = arith.constant dense<0xFF800000> : vector<8xf32>
    %11 = vector.multi_reduction <maximumf>, %5, %cst_8 [1] : vector<8x16xf32> to vector<8xf32>
    %12 = vector.shape_cast %11 : vector<8xf32> to vector<8x1xf32>
    %13 = vector.broadcast %12 : vector<8x1xf32> to vector<8x16xf32>
    %14 = arith.subf %5, %13 : vector<8x16xf32>
    %15 = math.exp %14 : vector<8x16xf32>
    %16 = arith.subf %10, %12 : vector<8x1xf32>
    %17 = math.exp %16 : vector<8x1xf32>
    %c0_9 = arith.constant 0 : index
    %c0_10 = arith.constant 0 : index
    %18 = vector.load %arg4[%c0_9, %c0_10] : memref<8x1xi32, #tpu.memory_space<vmem>>, vector<8x1xi32>
    %c0_11 = arith.constant 0 : index
    %c0_12 = arith.constant 0 : index
    %19 = vector.load %arg5[%c0_11, %c0_12] : memref<1x16xi32, #tpu.memory_space<vmem>>, vector<1x16xi32>
    %20 = vector.broadcast %18 : vector<8x1xi32> to vector<8x16xi32>
    %21 = vector.broadcast %19 : vector<1x16xi32> to vector<8x16xi32>
    %22 = arith.cmpi eq, %20, %21 : vector<8x16xi32>
    %23 = arith.extui %22 : vector<8x16xi1> to vector<8x16xi32>
    %24 = arith.sitofp %23 : vector<8x16xi32> to vector<8x16xf32>
    %cst_13 = arith.constant dense<0.000000e+00> : vector<8xf32>
    %25 = vector.multi_reduction <add>, %15, %cst_13 [1] : vector<8x16xf32> to vector<8xf32>
    %26 = vector.shape_cast %25 : vector<8xf32> to vector<8x1xf32>
    %27 = arith.mulf %15, %24 : vector<8x16xf32>
    %cst_14 = arith.constant dense<0.000000e+00> : vector<8xf32>
    %28 = vector.multi_reduction <add>, %27, %cst_14 [1] : vector<8x16xf32> to vector<8xf32>
    %29 = vector.shape_cast %28 : vector<8xf32> to vector<8x1xf32>
    %30 = arith.subf %26, %29 : vector<8x1xf32>
    %31 = arith.addf %30, %17 : vector<8x1xf32>
    %32 = math.log %31 : vector<8x1xf32>
    %33 = arith.subf %10, %12 : vector<8x1xf32>
    %34 = arith.subf %32, %33 : vector<8x1xf32>
    %c0_15 = arith.constant 0 : index
    %c0_16 = arith.constant 0 : index
    %35 = vector.load %arg6[%c0_15, %c0_16] : memref<8x1xf32, #tpu.memory_space<vmem>>, vector<8x1xf32>
    tpu.vector_store %arg6[%c0_15, %c0_16], %34 {strides = array<i32>} : memref<8x1xf32, #tpu.memory_space<vmem>>, vector<8x1xf32>,
    return
  }
  func.func @transform_0(%arg0: i32) -> (i32, i32) {
    %c0_i32 = arith.constant 0 : i32
    %c0_i32_0 = arith.constant 0 : i32
    return %arg0, %c0_i32 : i32, i32
  }
  func.func @transform_1(%arg0: i32) -> (i32, i32) {
    %c0_i32 = arith.constant 0 : i32
    %c0_i32_0 = arith.constant 0 : i32
    %c0_i32_1 = arith.constant 0 : i32
    return %c0_i32, %c0_i32_0 : i32, i32
  }
  func.func @transform_2(%arg0: i32) -> (i32, i32) {
    %c0_i32 = arith.constant 0 : i32
    %c0_i32_0 = arith.constant 0 : i32
    return %arg0, %c0_i32 : i32, i32
  }
  func.func @transform_3(%arg0: i32) -> (i32, i32) {
    %c0_i32 = arith.constant 0 : i32
    %c0_i32_0 = arith.constant 0 : i32
    return %arg0, %c0_i32 : i32, i32
  }
  func.func @transform_4(%arg0: i32) -> (i32, i32) {
    %c0_i32 = arith.constant 0 : i32
    %c0_i32_0 = arith.constant 0 : i32
    %c0_i32_1 = arith.constant 0 : i32
    return %c0_i32, %c0_i32_0 : i32, i32
  }
  func.func @transform_5(%arg0: i32) -> (i32, i32) {
    %c0_i32 = arith.constant 0 : i32
    %c0_i32_0 = arith.constant 0 : i32
    return %arg0, %c0_i32 : i32, i32
  }
}

</mosaic_0001>

<bundles_post_ra>
// kernel: smt5_cl_forward.5
= control target key start
LH: loop header
LB: loop body
LE: loop exit
PB: predicated region body
PF: predicated region fallthrough
CT: control target
= control target key end

     0   :  { %s532_s18 = smov 0   ;;  %s581_s0 = inlined_call_operand.vmem [shape: f32[16,256], index: 0, kind: input, shape index: {}]   ;;  %s582_s1 = inlined_call_operand.vmem [shape: f32[16,256], index: 1, kind: input, shape index: {}, may-alias: {1,2}]   ;;  %s583_s2 = inlined_call_operand.vmem [shape: f32[16,256], index: 2, kind: input, shape index: {}, may-alias: {1,2}]   ;;  %s584_s3 = inlined_call_operand.vmem [shape: s32[16,1], index: 3, kind: input, shape index: {}]   ;;  %s585_s4 = inlined_call_operand.vmem [shape: s32[1,16], index: 4, kind: input, shape index: {}]   ;;  %s586_s5 = inlined_call_operand.vmem [shape: f32[16,1], index: 5, kind: output, shape index: {}]  }
   0x1 LB: > { %s458_s19 = sadd.s32 4294967295, %s498_s18   ;;  %p462_p0 = scmp.ge.s32.totalorder %s498_s18, 1  ;;  %s498_s18 = sphi %s532_s18, %s15_s18  }
   0x2   : > { %p206_p1 = scmp.lt.s32.totalorder %s498_s18, 3 }
   0x4   : > { %p207_p2 = pnand %p462_p0, %p206_p1 }
   0x5   : > { %p242_p3 = scmp.lt.s32.totalorder (!%p207_p2), %s458_s19, 1 }
   0x6   : > { %210 = sbr.rel (%p207_p2) target bundleno = 538 (0x21a), region = 40 }
   0xb   : > { %v265_v0 = vld [vmem:[%s582_s1 + $0x18] sm:$0xff]  ;;  %v264_v1 = vld [vmem:[%s582_s1 + $0x10] sm:$0xff]  ;;  %v263_v2 = vld [vmem:[%s582_s1 + $0x8] sm:$0xff]  ;;  %s588_s19 = smov (!%p242_p3, %s458_s19), 1  ;;  %v500_v11 = vmov 0   ;;  %vm345_vm0 = vcmask 130048  }
   0xc   : > { %296 = vmatprep.subr.mxu0 %v265_v0  ;;  %v262_v3 = vld [vmem:[%s582_s1] sm:$0xff]  ;;  %s473_s28 = sshll.u32 %s588_s19, 4  ;;  %485 = vset.pattern.permute.xlu0 %v500_v11  ;;  %s467_s10 = sshll.u32 %s588_s19, 3  ;;  %v501_v22 = vmov 0.0   ;;  %vm379_vm2 = vcmask 7168  }
   0xd   : > { %297 = vmatpush1.xpose.msra.mxu0 %v264_v1  ;;  %s246_s6 = scalar_lea.vmem %s581_s0, %s473_s28  ;;  %s251_s9 = scalar_lea.vmem %s583_s2, %s473_s28  ;;  %v469_v20 = vld [vmem:[%s585_s4] ss:$0 sm:$0xff] }
   0xe   : > { %298 = vmatprep.subr.mxu0 %v263_v2  ;;  %v261_v4 = vld [vmem:[%s246_s6 + $0x8] sm:$0xff]  ;;  %v260_v6 = vld [vmem:[%s246_s6] sm:$0xff]  ;;  %s255_s13 = scalar_lea.vmem %s584_s3, %s467_s10  ;;  %s259_s20 = scalar_lea.vmem %s586_s5, %s467_s10 }
   0xf   : > { %v267_v5 = vld [vmem:[%s251_s9 + $0x8] sm:$0xff]  ;;  %332 = vmatprep.mubr.f32.mxu0 %v261_v4  ;;  %v266_v8 = vld [vmem:[%s251_s9] sm:$0xff] }
  0x10   : > { %v340_v7 = vmul.f32 %v267_v5, %v261_v4  ;;  %v339_v9 = vmul.f32 %v266_v8, %v260_v6  ;;  %v355_v16 = vld [vmem:[%s255_s13] sm:$0xff] }
  0x11   : > { %299 = vmatpush1.xpose.msra.mxu0 %v262_v3 }
  0x12   : > { %v341_v10 = vadd.f32 %v340_v7, %v339_v9 }
  0x14   : > { %333 = vmatmul.mubr.f32.vlgmr.msra.gmra.mxu0 %v260_v6  ;;  %342 = vadd.xlane.f32.xlu1 %v341_v10 }
  0x9d   : > { %v343_v28 = vpop.xlane.xlu1 %342 }
  0x9e   : > { %v344_v29 = vmul.f32 20.0, %v343_v28 }
  0xd4   : > { %v334_v12 = vpop.f32.mrf.mxu0 }
  0xd5   : > { %v338_v13 = vmul.f32 20.0, %v334_v12 }
  0xd6   : > { %v336_v14 = vpop.f32.mrf.mxu0 }
  0xd7   : > { %v346_v15 = vsel %vm345_vm0, %v338_v13, -inf }
  0xd8   : > { %347 = vmax.xlane.f32.xlu0 %v346_v15 }
  0xee   : > { %358 = vperm.xlu0 %485, %v355_v16  }
 0x161   : > { %v348_v17 = vpop.xlane.xlu0 %347 }
 0x162   : > { %v349_v18 = vsub.f32 %v338_v13, %v348_v17  ;;  %v352_v30 = vsub.f32 %v344_v29, %v348_v17 }
 0x164   : > { %v350_v19 = vmul.f32 1.442695, %v349_v18  ;;  %v353_v31 = vmul.f32 1.442695, %v352_v30 }
 0x166   : > { %486 = vpow2.f32 %v350_v19 }
 0x167   : > { %488 = vpow2.f32 %v353_v31 }
 0x169   : > { %v359_v21 = vpop.permute.xlu0 %358 }
 0x16a   : > { %vm364_vm1 = vcmp.eq.s32.totalorder %v359_v21, %v469_v20 }
 0x16b   : > { %v470_v23 = vsel %vm364_vm1, 1.0, %v501_v22 }
 0x173   : > { %v487_v24 = vpop.eup %486 }
 0x174   : > { %v367_v25 = vsel %vm345_vm0, %v487_v24, 0.0  ;;  %v370_v26 = vmul.f32 %v487_v24, %v470_v23  ;;  %v489_v35 = vpop.eup %488 }
 0x175   : > { %368 = vadd.xlane.f32.xlu1 %v367_v25 }
 0x176   : > { %v371_v27 = vsel %vm345_vm0, %v370_v26, 0.0 }
 0x179   : > { %372 = vadd.xlane.f32.xlu1 %v371_v27 }
 0x1fe   : > { %v369_v32 = vpop.xlane.xlu1 %368 }
 0x202   : > { %v373_v33 = vpop.xlane.xlu1 %372 }
 0x203   : > { %v374_v34 = vsub.f32 %v369_v32, %v373_v33 }
 0x205   : > { %v375_v36 = vadd.f32 %v489_v35, %v374_v34 }
 0x207   : > { %490 = vlog2.f32 %v375_v36 }
 0x214   : > { %v491_v37 = vpop.eup %490 }
 0x215   : > { %v377_v38 = vmul.f32 0.6931472, %v491_v37 }
 0x217   : > { %v378_v39 = vsub.f32 %v377_v38, %v352_v30 }
 0x219   : > { %380 = vst.msk [vmem:[%s259_s20] sm:$0xff] %vm379_vm2, %v378_v39 }
 0x21a PF: > { %s15_s18 = sadd.s32 1, %s498_s18  }
 0x21b   : > { %p12_p4 = scmp.ge.s32.totalorder %s15_s18, 4  }
 0x21d   :  { %14 = sbr.rel (!%p12_p4) target bundleno = 1 (0x1), region = 76 }

// kernel: smt5_cl_forward.3
= control target key start
LH: loop header
LB: loop body
LE: loop exit
PB: predicated region body
PF: predicated region fallthrough
CT: control target
= control target key end

     0   :  { %s1084_s15 = smov 0   ;;  %s1246_s0 = inlined_call_operand.vmem [shape: bf16[16,16,128], index: 0, kind: input, shape index: {}]   ;;  %s1247_s1 = inlined_call_operand.vmem [shape: bf16[16,16,1], index: 1, kind: input, shape index: {}]   ;;  %s1248_s2 = inlined_call_operand.vmem [shape: bf16[128,256], index: 2, kind: input, shape index: {}]   ;;  %s1249_s3 = inlined_call_operand.vmem [shape: f32[1,256], index: 3, kind: input, shape index: {}]   ;;  %s1250_s4 = inlined_call_operand.vmem [shape: f32[16,256], index: 4, kind: output, shape index: {}]  }
   0x1 LB: > { %s1090_s16 = sadd.s32 4294967295, %s1055_s15   ;;  %p965_p0 = scmp.ge.s32.totalorder %s1055_s15, 1  ;;  %s1055_s15 = sphi %s1084_s15, %s14_s15  }
   0x2   : > { %p176_p1 = scmp.lt.s32.totalorder %s1055_s15, 3 }
   0x4   : > { %p177_p2 = pnand %p965_p0, %p176_p1 }
   0x5   : > { %s966_s17 = sshll.u32 (!%p177_p2), %s1090_s16, 3  ;;  %p223_p4 = scmp.lt.s32.totalorder (!%p177_p2), %s1090_s16, 1 }
   0x6   : > { %180 = sbr.rel (%p177_p2) target bundleno = 566 (0x236), region = 36  ;;  %p210_p3 = scmp.lt.s32.totalorder (!%p177_p2), %s966_s17, 15 }
   0xb   : > { %v1057_v0 = vmov 0   ;;  %s1252_s17 = smov (!%p210_p3, %s966_s17), 15  ;;  %vm557_vm0 = vcmask 7168   ;;  %vm746_vm1 = vcmask 1041409   ;;  %vm748_vm2 = vcmask 1042434   ;;  %s1254_s16 = smov (!%p223_p4, %s1090_s16), 1 }
   0xc   : > { %1006 = vset.pattern.permute.xlu1 %v1057_v0  ;;  %1005 = vset.pattern.permute.xlu0 %v1057_v0  ;;  %s992_s18 = sshll.u32 %s1252_s17, 3  ;;  %vm750_vm3 = vcmask 1043459   ;;  %vm752_vm4 = vcmask 1044484   ;;  %vm754_vm5 = vcmask 1045509   ;;  %vm756_vm6 = vcmask 1046534   ;;  %s994_s9 = sshll.u32 %s1254_s16, 4 }
   0xd   : > { %874 = vmatprep.mubr.bf16.mxu0 %v1057_v0  ;;  %s1103_s21 = scalar_lea.vmem %s1247_s1, %s992_s18  ;;  %s1199_s8 = scalar_lea.vmem %s1246_s0, %s992_s18  ;;  %vm758_vm7 = vcmask 1047559  }
   0xe   : > { %v247_v1 = vld [vmem:[%s1103_s21 + $0x8] sm:$0xf]  ;;  %v245_v2 = vld [vmem:[%s1103_s21] sm:$0xf]  ;;  %v248_v3 = vld [vmem:[%s1103_s21 + $0xc] sm:$0xf]  ;;  %s227_s12 = scalar_lea.vmem %s1250_s4, %s994_s9 }
   0xf   : > { %287 = vperm.xlu1 %1006, %v247_v1   ;;  %v543_v4 = vunpack.c.l.bf16 %v247_v1  ;;  %263 = vperm.xlu0 %1005, %v245_v2   ;;  %v541_v5 = vunpack.c.l.bf16 %v245_v2  ;;  %v544_v6 = vunpack.c.l.bf16 %v248_v3  ;;  %v246_v7 = vld [vmem:[%s1103_s21 + $0x4] sm:$0xf]  ;;  %v250_v8 = vld [vmem:[%s1103_s21 + $0x14] sm:$0xf]  ;;  %v249_v9 = vld [vmem:[%s1103_s21 + $0x10] sm:$0xf] }
  0x10   : > { %v542_v10 = vunpack.c.l.bf16 %v246_v7  ;;  %v546_v11 = vunpack.c.l.bf16 %v250_v8  ;;  %v545_v12 = vunpack.c.l.bf16 %v249_v9  ;;  %v252_v13 = vld [vmem:[%s1103_s21 + $0x1c] sm:$0xf]  ;;  %v251_v14 = vld [vmem:[%s1103_s21 + $0x18] sm:$0xf]  ;;  %v254_v19 = vld [vmem:[%s1103_s21 + $0x24] sm:$0xf] }
  0x11   : > { %v567_v15 = vsel %vm557_vm0, %v543_v4, 0.0  ;;  %v558_v16 = vsel %vm557_vm0, %v541_v5, 0.0  ;;  %v568_v17 = vsel %vm557_vm0, %v544_v6, 0.0  ;;  %v548_v18 = vunpack.c.l.bf16 %v252_v13  ;;  %v1121_v24 = vld [vmem:[%s1103_s21 + $0x2c] sm:$0xf] }
  0x12   : > { %v569_v20 = vadd.f32 %v568_v17, %v567_v15  ;;  %v559_v21 = vsel %vm557_vm0, %v542_v10, 0.0  ;;  %v577_v22 = vsel %vm557_vm0, %v546_v11, 0.0  ;;  %v576_v23 = vsel %vm557_vm0, %v545_v12, 0.0  ;;  %v253_v29 = vld [vmem:[%s1103_s21 + $0x20] sm:$0xf] }
  0x13   : > { %299 = vperm.xlu1 %1006, %v248_v3   ;;  %275 = vperm.xlu0 %1005, %v246_v7   ;;  %v560_v25 = vadd.f32 %v559_v21, %v558_v16  ;;  %v578_v26 = vadd.f32 %v577_v22, %v576_v23  ;;  %v586_v27 = vsel %vm557_vm0, %v548_v18, 0.0  ;;  %v547_v28 = vunpack.c.l.bf16 %v251_v14  ;;  %v255_v30 = vld [vmem:[%s1103_s21 + $0x28] sm:$0xf]  ;;  %v258_v35 = vld [vmem:[%s1103_s21 + $0x34] sm:$0xf] }
  0x14   : > { %v570_v31 = vrot.slane %v569_v20, 4  ;;  %v550_v32 = vunpack.c.l.bf16 %v254_v19  ;;  %v549_v33 = vunpack.c.l.bf16 %v253_v29  ;;  %v552_v34 = vunpack.c.l.bf16 %v1121_v24  ;;  %v257_v40 = vld [vmem:[%s1103_s21 + $0x30] sm:$0xf]  ;;  %v260_v45 = vld [vmem:[%s1103_s21 + $0x3c] sm:$0xf] }
  0x15   : > { %v561_v36 = vrot.slane %v560_v25, 4  ;;  %v579_v37 = vrot.slane %v578_v26, 4  ;;  %v585_v38 = vsel %vm557_vm0, %v547_v28, 0.0  ;;  %v551_v39 = vunpack.c.l.bf16 %v255_v30  ;;  %v259_v46 = vld [vmem:[%s1103_s21 + $0x38] sm:$0xf] }
  0x16   : > { %v571_v41 = vadd.f32 %v570_v31, %v569_v20  ;;  %v587_v42 = vadd.f32 %v586_v27, %v585_v38  ;;  %v595_v43 = vsel %vm557_vm0, %v550_v32, 0.0  ;;  %v594_v44 = vsel %vm557_vm0, %v549_v33, 0.0 }
  0x17   : > { %v562_v47 = vadd.f32 %v561_v36, %v560_v25  ;;  %323 = vperm.xlu1 %1006, %v250_v8   ;;  %v580_v48 = vadd.f32 %v579_v37, %v578_v26  ;;  %311 = vperm.xlu0 %1005, %v249_v9   ;;  %v596_v49 = vadd.f32 %v595_v43, %v594_v44  ;;  %v604_v50 = vsel %vm557_vm0, %v552_v34, 0.0  ;;  %v1009_v44 = vld [vmem:[%s1248_s2 + $0x70] ss:$8 sps:$4 sm:$0xff]  }
  0x18   : > { %v588_v51 = vrot.slane %v587_v42, 4  ;;  %v603_v52 = vsel %vm557_vm0, %v551_v39, 0.0  ;;  %v554_v53 = vunpack.c.l.bf16 %v258_v35  ;;  %v553_v54 = vunpack.c.l.bf16 %v257_v40 }
  0x19   : > { %v597_v55 = vrot.slane %v596_v49, 4  ;;  %v605_v56 = vadd.f32 %v604_v50, %v603_v52  ;;  %v556_v57 = vunpack.c.l.bf16 %v260_v45  ;;  %v555_v58 = vunpack.c.l.bf16 %v259_v46  ;;  %v1012_v50 = vld [vmem:[%s1248_s2 + $0x60] ss:$8 sps:$4 sm:$0xff]  }
  0x1a   : > { %v589_v59 = vadd.f32 %v588_v51, %v587_v42  ;;  %v613_v60 = vsel %vm557_vm0, %v554_v53, 0.0  ;;  %v612_v61 = vsel %vm557_vm0, %v553_v54, 0.0  ;;  %v572_v62 = vrot.slane %v571_v41, 2  ;;  %v1013_v51 = vld [vmem:[%s1248_s2 + $0x54] ss:$8 sps:$4 sm:$0xff]  }
  0x1b   : > { %347 = vperm.xlu1 %1006, %v252_v13   ;;  %335 = vperm.xlu0 %1005, %v251_v14   ;;  %v606_v63 = vrot.slane %v605_v56, 4  ;;  %v614_v0 = vadd.f32 %v613_v60, %v612_v61  ;;  %v622_v1 = vsel %vm557_vm0, %v556_v57, 0.0  ;;  %v621_v2 = vsel %vm557_vm0, %v555_v58, 0.0  ;;  %v1015_v54 = vld [vmem:[%s1248_s2 + $0x50] ss:$8 sps:$4 sm:$0xff]  }
  0x1c   : > { %v563_v3 = vrot.slane %v562_v47, 2  ;;  %v623_v4 = vadd.f32 %v622_v1, %v621_v2  ;;  %v598_v5 = vadd.f32 %v597_v55, %v596_v49  ;;  %v573_v6 = vadd.f32 %v572_v62, %v571_v41  ;;  %v1016_v55 = vld [vmem:[%s1248_s2 + $0x44] ss:$8 sps:$4 sm:$0xff]   ;;  %v1019_v57 = vld [vmem:[%s1248_s2 + $0x34] ss:$8 sps:$4 sm:$0xff]  }
  0x1d   : > { %v590_v7 = vrot.slane %v589_v59, 2  ;;  %v581_v8 = vrot.slane %v580_v48, 2  ;;  %v607_v9 = vadd.f32 %v606_v63, %v605_v56  ;;  %v615_v10 = vrot.slane %v614_v0, 4  ;;  %v1018_v56 = vld [vmem:[%s1248_s2 + $0x40] ss:$8 sps:$4 sm:$0xff]  }
  0x1e   : > { %v624_v11 = vrot.slane %v623_v4, 4  ;;  %v564_v12 = vadd.f32 %v563_v3, %v562_v47  ;;  %v574_v13 = vrot.slane %v573_v6, 1  ;;  %v599_v16 = vrot.slane %v598_v5, 2  ;;  %v1021_v58 = vld [vmem:[%s1248_s2 + $0x30] ss:$8 sps:$4 sm:$0xff]  }
  0x1f   : > { %371 = vperm.xlu1 %1006, %v254_v19   ;;  %359 = vperm.xlu0 %1005, %v253_v29   ;;  %v591_v14 = vadd.f32 %v590_v7, %v589_v59  ;;  %v582_v15 = vadd.f32 %v581_v8, %v580_v48  ;;  %v616_v17 = vadd.f32 %v615_v10, %v614_v0  ;;  %v608_v21 = vrot.slane %v607_v9, 2  ;;  %v1022_v59 = vld [vmem:[%s1248_s2 + $0x24] ss:$8 sps:$4 sm:$0xff]   ;;  %v1024_v60 = vld [vmem:[%s1248_s2 + $0x20] ss:$8 sps:$4 sm:$0xff]  }
  0x20   : > { %v625_v18 = vadd.f32 %v624_v11, %v623_v4  ;;  %v565_v20 = vrot.slane %v564_v12, 1  ;;  %v575_v22 = vadd.f32 %v574_v13, %v573_v6  ;;  %v600_v19 = vadd.f32 %v599_v16, %v598_v5  ;;  %v1025_v61 = vld [vmem:[%s1248_s2 + $0x14] ss:$8 sps:$4 sm:$0xff]   ;;  %v1027_v62 = vld [vmem:[%s1248_s2 + $0x10] ss:$8 sps:$4 sm:$0xff]  }
  0x21   : > { %v592_v23 = vrot.slane %v591_v14, 1  ;;  %v583_v25 = vrot.slane %v582_v15, 1  ;;  %v609_v27 = vadd.f32 %v608_v21, %v607_v9  ;;  %v617_v29 = vrot.slane %v616_v17, 2  ;;  %v1028_v63 = vld [vmem:[%s1248_s2 + $0x4] ss:$8 sps:$4 sm:$0xff]  }
  0x22   : > { %v566_v26 = vadd.f32 %v565_v20, %v564_v12  ;;  %v626_v28 = vrot.slane %v625_v18, 2  ;;  %v631_v31 = vmax.f32 %v575_v22, 1e-09  ;;  %v601_v34 = vrot.slane %v600_v19, 1  ;;  %v1030_v0 = vld [vmem:[%s1248_s2] ss:$8 sps:$4 sm:$0xff]  }
  0x23   : > { %395 = vperm.xlu1 %1006, %v1121_v24   ;;  %383 = vperm.xlu0 %1005, %v255_v30   ;;  %v593_v32 = vadd.f32 %v592_v23, %v591_v14  ;;  %v584_v33 = vadd.f32 %v583_v25, %v582_v15  ;;  %v610_v30 = vrot.slane %v609_v27, 1  ;;  %v618_v37 = vadd.f32 %v617_v29, %v616_v17  ;;  %v232_v15 = vld [vmem:[%s1199_s8 + $0xc] sm:$0xf]  ;;  %v230_v16 = vld [vmem:[%s1199_s8 + $0x4] sm:$0xf] }
  0x24   : > { %v630_v24 = vmax.f32 %v566_v26, 1e-09  ;;  %v627_v36 = vadd.f32 %v626_v28, %v625_v18  ;;  %v602_v39 = vadd.f32 %v601_v34, %v600_v19  ;;  %v1058_v1 = vmov 839922192   ;;  %v231_v20 = vld [vmem:[%s1199_s8 + $0x8] sm:$0xf] }
  0x25   : > { %v633_v38 = vmax.f32 %v593_v32, 1e-09  ;;  %v611_v41 = vadd.f32 %v610_v30, %v609_v27  ;;  %v619_v43 = vrot.slane %v618_v37, 1  ;;  %v267_v2 = vunpack.c.l.s4 %v1058_v1  ;;  %v229_v21 = vld [vmem:[%s1199_s8] sm:$0xf] }
  0x26   : > { %v628_v42 = vrot.slane %v627_v36, 1  ;;  %v634_v47 = vmax.f32 %v602_v39, 1e-09  ;;  %v269_v3 = vlaneseq  ;;  %v234_v26 = vld [vmem:[%s1199_s8 + $0x14] sm:$0xf] }
  0x27   : > { %419 = vperm.xlu1 %1006, %v258_v35   ;;  %407 = vperm.xlu0 %1005, %v257_v40   ;;  %v1007_v35 = vld [vmem:[%s1248_s2 + $0x74] ss:$8 sps:$4 sm:$0xff]   ;;  %v632_v40 = vmax.f32 %v584_v33, 1e-09  ;;  %v620_v49 = vadd.f32 %v619_v43, %v618_v37  ;;  %v268_v6 = vunpack.c.0.s8 %v267_v2  ;;  %v233_v32 = vld [vmem:[%s1199_s8 + $0x10] sm:$0xf] }
  0x28   : > { %842 = vmatprep.subr.bf16.mxu0 %v1007_v35  ;;  %v629_v48 = vadd.f32 %v628_v42, %v627_v36  ;;  %v1189_v7 = vshrl.u32 %v269_v3, 7  ;;  %v236_v33 = vld [vmem:[%s1199_s8 + $0x1c] sm:$0xf] }
  0x29   : > { %843 = vmatpush1.bf16.msra.mxu0 %v1009_v44  ;;  %v636_v53 = vmax.f32 %v620_v49, 1e-09 }
  0x2a   : > { %v637_v52 = vmax.f32 %v629_v48, 1e-09  ;;  %v1192_v10 = vsub.s32 %v268_v6, %v1189_v7  ;;  %v237_v48 = vld [vmem:[%s1199_s8 + $0x20] sm:$0xf]  ;;  %v241_v6 = vld [vmem:[%s1199_s8 + $0x30] sm:$0xf] }
  0x2b   : > { %443 = vperm.xlu1 %1006, %v260_v45   ;;  %431 = vperm.xlu0 %1005, %v259_v46   ;;  %v1010_v45 = vld [vmem:[%s1248_s2 + $0x64] ss:$8 sps:$4 sm:$0xff]   ;;  %v635_v46 = vmax.f32 %v611_v41, 1e-09 }
  0x2c   : > { %844 = vmatprep.subr.bf16.mxu0 %v1010_v45 }
  0x2d   : > { %845 = vmatpush1.bf16.msra.mxu0 %v1012_v50 }
  0x2e   : > { %846 = vmatprep.subr.bf16.mxu0 %v1013_v51 }
  0x2f   : > { %645 = vperm.xlu1 %1006, %v631_v31   ;;  %640 = vperm.xlu0 %1005, %v630_v24   ;;  %v235_v24 = vld [vmem:[%s1199_s8 + $0x18] sm:$0xf] }
  0x31   : > { %847 = vmatpush1.bf16.msra.mxu0 %v1015_v54 }
  0x32   : > { %848 = vmatprep.subr.bf16.mxu0 %v1016_v55 }
  0x33   : > { %655 = vperm.xlu1 %1006, %v633_v38   ;;  %650 = vperm.xlu0 %1005, %v632_v40  }
  0x35   : > { %849 = vmatpush1.bf16.msra.mxu0 %v1018_v56 }
  0x36   : > { %850 = vmatprep.subr.bf16.mxu0 %v1019_v57  ;;  %v240_v57 = vld [vmem:[%s1199_s8 + $0x2c] sm:$0xf] }
  0x37   : > { %665 = vperm.xlu1 %1006, %v635_v46   ;;  %660 = vperm.xlu0 %1005, %v634_v47   ;;  %v238_v47 = vld [vmem:[%s1199_s8 + $0x24] sm:$0xf] }
  0x39   : > { %851 = vmatpush1.bf16.msra.mxu0 %v1021_v58  ;;  %v239_v58 = vld [vmem:[%s1199_s8 + $0x28] sm:$0xf] }
  0x3a   : > { %852 = vmatprep.subr.bf16.mxu0 %v1022_v59 }
  0x3b   : > { %675 = vperm.xlu1 %1006, %v637_v52   ;;  %670 = vperm.xlu0 %1005, %v636_v53  }
  0x3d   : > { %853 = vmatpush1.bf16.msra.mxu0 %v1024_v60 }
  0x3e   : > { %854 = vmatprep.subr.bf16.mxu0 %v1025_v61 }
  0x41   : > { %855 = vmatpush1.bf16.msra.mxu0 %v1027_v62 }
  0x42   : > { %856 = vmatprep.subr.bf16.mxu0 %v1028_v63 }
  0x45   : > { %857 = vmatpush1.bf16.msra.mxu0 %v1030_v0 }
  0x8a   : > { %v288_v4 = vpop.permute.xlu1 %287  ;;  %v264_v5 = vpop.permute.xlu0 %263 }
  0x8b   : > { %v296_v17 = vrot.slane %v288_v4, %v1192_v10  ;;  %v272_v18 = vrot.slane %v264_v5, %v1192_v10  ;;  %v242_v4 = vld [vmem:[%s1199_s8 + $0x34] sm:$0xf] }
  0x8d   : > { %v455_v29 = vmul.bf16 %v296_v17, %v231_v20  ;;  %v453_v31 = vmul.bf16 %v272_v18, %v229_v21 }
  0x8e   : > { %v300_v8 = vpop.permute.xlu1 %299  ;;  %v276_v9 = vpop.permute.xlu0 %275 }
  0x8f   : > { %v308_v11 = vrot.slane %v300_v8, %v1192_v10  ;;  %v284_v12 = vrot.slane %v276_v9, %v1192_v10  ;;  %v471_v43 = vunpack.c.l.bf16 %v455_v29  ;;  %v469_v44 = vunpack.c.l.bf16 %v453_v31 }
  0x91   : > { %v456_v22 = vmul.bf16 %v308_v11, %v232_v15  ;;  %v454_v23 = vmul.bf16 %v284_v12, %v230_v16 }
  0x92   : > { %v324_v13 = vpop.permute.xlu1 %323  ;;  %v312_v14 = vpop.permute.xlu0 %311 }
  0x93   : > { %v332_v27 = vrot.slane %v324_v13, %v1192_v10  ;;  %v320_v28 = vrot.slane %v312_v14, %v1192_v10  ;;  %v472_v36 = vunpack.c.l.bf16 %v456_v22  ;;  %v470_v37 = vunpack.c.l.bf16 %v454_v23 }
  0x95   : > { %v458_v35 = vmul.bf16 %v332_v27, %v234_v26  ;;  %v457_v40 = vmul.bf16 %v320_v28, %v233_v32  ;;  %v492_v49 = vadd.f32 %v472_v36, %v471_v43  ;;  %v485_v50 = vadd.f32 %v470_v37, %v469_v44  ;;  %v243_v26 = vld [vmem:[%s1199_s8 + $0x38] sm:$0xf] }
  0x96   : > { %v348_v25 = vpop.permute.xlu1 %347  ;;  %v336_v19 = vpop.permute.xlu0 %335 }
  0x97   : > { %v356_v34 = vrot.slane %v348_v25, %v1192_v10  ;;  %v344_v30 = vrot.slane %v336_v19, %v1192_v10  ;;  %v474_v53 = vunpack.c.l.bf16 %v458_v35  ;;  %v473_v54 = vunpack.c.l.bf16 %v457_v40  ;;  %v244_v25 = vld [vmem:[%s1199_s8 + $0x3c] sm:$0xf] }
  0x98   : > { %v493_v63 = vrot.slane %v492_v49, 4  ;;  %v486_v0 = vrot.slane %v485_v50, 4 }
  0x99   : > { %v460_v41 = vmul.bf16 %v356_v34, %v236_v33  ;;  %v459_v42 = vmul.bf16 %v344_v30, %v235_v24  ;;  %v499_v8 = vadd.f32 %v474_v53, %v473_v54 }
  0x9a   : > { %v372_v38 = vpop.permute.xlu1 %371  ;;  %v360_v39 = vpop.permute.xlu0 %359  ;;  %v494_v20 = vadd.f32 %v493_v63, %v492_v49  ;;  %v487_v21 = vadd.f32 %v486_v0, %v485_v50 }
  0x9b   : > { %v380_v45 = vrot.slane %v372_v38, %v1192_v10  ;;  %v368_v46 = vrot.slane %v360_v39, %v1192_v10  ;;  %v476_v55 = vunpack.c.l.bf16 %v460_v41  ;;  %v475_v56 = vunpack.c.l.bf16 %v459_v42 }
  0x9c   : > { %v500_v31 = vrot.slane %v499_v8, 4  ;;  %v495_v36 = vrot.slane %v494_v20, 2  ;;  %v488_v37 = vrot.slane %v487_v21, 2 }
  0x9d   : > { %v462_v59 = vmul.bf16 %v380_v45, %v238_v47  ;;  %v461_v60 = vmul.bf16 %v368_v46, %v237_v48  ;;  %v506_v9 = vadd.f32 %v476_v55, %v475_v56 }
  0x9e   : > { %v396_v51 = vpop.permute.xlu1 %395  ;;  %v384_v52 = vpop.permute.xlu0 %383  ;;  %v501_v43 = vadd.f32 %v500_v31, %v499_v8  ;;  %v496_v46 = vadd.f32 %v495_v36, %v494_v20  ;;  %v489_v50 = vadd.f32 %v488_v37, %v487_v21 }
  0x9f   : > { %v404_v61 = vrot.slane %v396_v51, %v1192_v10  ;;  %v392_v62 = vrot.slane %v384_v52, %v1192_v10  ;;  %v478_v13 = vunpack.c.l.bf16 %v462_v59  ;;  %v477_v14 = vunpack.c.l.bf16 %v461_v60 }
  0xa0   : > { %v507_v27 = vrot.slane %v506_v9, 4  ;;  %v502_v53 = vrot.slane %v501_v43, 2  ;;  %v497_v56 = vrot.slane %v496_v46, 1  ;;  %v490_v60 = vrot.slane %v489_v50, 1 }
  0xa1   : > { %v464_v1 = vmul.bf16 %v404_v61, %v240_v57  ;;  %v463_v2 = vmul.bf16 %v392_v62, %v239_v58  ;;  %v513_v32 = vadd.f32 %v478_v13, %v477_v14 }
  0xa2   : > { %v420_v3 = vpop.permute.xlu1 %419  ;;  %v408_v5 = vpop.permute.xlu0 %407  ;;  %v508_v40 = vadd.f32 %v507_v27, %v506_v9  ;;  %v503_v63 = vadd.f32 %v502_v53, %v501_v43 }
  0xa3   : > { %v428_v11 = vrot.slane %v420_v3, %v1192_v10  ;;  %v416_v12 = vrot.slane %v408_v5, %v1192_v10  ;;  %v480_v15 = vunpack.c.l.bf16 %v464_v1  ;;  %v479_v16 = vunpack.c.l.bf16 %v463_v2 }
  0xa4   : > { %v514_v44 = vrot.slane %v513_v32, 4  ;;  %v509_v51 = vrot.slane %v508_v40, 2  ;;  %v498_v2 = vadd.f32 %v497_v56, %v496_v46 }
  0xa5   : > { %v466_v17 = vmul.bf16 %v428_v11, %v242_v4  ;;  %v465_v18 = vmul.bf16 %v416_v12, %v241_v6  ;;  %v520_v22 = vadd.f32 %v480_v15, %v479_v16  ;;  %v491_v6 = vadd.f32 %v490_v60, %v489_v50 }
  0xa6   : > { %v444_v23 = vpop.permute.xlu1 %443  ;;  %v432_v19 = vpop.permute.xlu0 %431  ;;  %v515_v54 = vadd.f32 %v514_v44, %v513_v32  ;;  %v510_v61 = vadd.f32 %v509_v51, %v508_v40  ;;  %v504_v12 = vrot.slane %v503_v63, 1 }
  0xa7   : > { %v452_v28 = vrot.slane %v444_v23, %v1192_v10  ;;  %v440_v29 = vrot.slane %v432_v19, %v1192_v10  ;;  %v482_v33 = vunpack.c.l.bf16 %v466_v17  ;;  %v481_v34 = vunpack.c.l.bf16 %v465_v18 }
  0xa8   : > { %v521_v38 = vrot.slane %v520_v22, 4  ;;  %v516_v0 = vrot.slane %v515_v54, 2  ;;  %v511_v8 = vrot.slane %v510_v61, 1 }
  0xa9   : > { %v468_v24 = vmul.bf16 %v452_v28, %v244_v25  ;;  %v467_v30 = vmul.bf16 %v440_v29, %v243_v26  ;;  %v527_v45 = vadd.f32 %v482_v33, %v481_v34  ;;  %v505_v25 = vadd.f32 %v504_v12, %v503_v63 }
  0xaa   : > { %v646_v39 = vpop.permute.xlu1 %645  ;;  %v641_v35 = vpop.permute.xlu0 %640  ;;  %v522_v47 = vadd.f32 %v521_v38, %v520_v22  ;;  %v517_v13 = vadd.f32 %v516_v0, %v515_v54  ;;  %v512_v20 = vadd.f32 %v511_v8, %v510_v61 }
  0xab   : > { %v484_v41 = vunpack.c.l.bf16 %v468_v24  ;;  %v483_v42 = vunpack.c.l.bf16 %v467_v30  ;;  %1031 = vrcp.f32 %v646_v39  ;;  %v528_v55 = vrot.slane %v527_v45, 4 }
  0xac   : > { %1033 = vrcp.f32 %v641_v35  ;;  %v523_v57 = vrot.slane %v522_v47, 2  ;;  %v518_v19 = vrot.slane %v517_v13, 1 }
  0xad   : > { %v534_v10 = vadd.f32 %v484_v41, %v483_v42  ;;  %v529_v1 = vadd.f32 %v528_v55, %v527_v45 }
  0xae   : > { %v656_v48 = vpop.permute.xlu1 %655  ;;  %v651_v49 = vpop.permute.xlu0 %650  ;;  %v524_v3 = vadd.f32 %v523_v57, %v522_v47  ;;  %v519_v37 = vadd.f32 %v518_v19, %v517_v13 }
  0xaf   : > { %v535_v52 = vrot.slane %v534_v10, 4  ;;  %1035 = vrcp.f32 %v656_v48  ;;  %v530_v14 = vrot.slane %v529_v1, 2 }
  0xb0   : > { %1037 = vrcp.f32 %v651_v49  ;;  %v525_v17 = vrot.slane %v524_v3, 1 }
  0xb1   : > { %v536_v62 = vadd.f32 %v535_v52, %v534_v10  ;;  %v531_v26 = vadd.f32 %v530_v14, %v529_v1  ;;  %v722_v1 = vsub.s32 0, %v1189_v7 }
  0xb2   : > { %v666_v58 = vpop.permute.xlu1 %665  ;;  %v661_v59 = vpop.permute.xlu0 %660  ;;  %v526_v31 = vadd.f32 %v525_v17, %v524_v3  ;;  %v726_v3 = vsub.s32 1, %v1189_v7 }
  0xb3   : > { %1039 = vrcp.f32 %v666_v58  ;;  %v537_v9 = vrot.slane %v536_v62, 2  ;;  %v532_v38 = vrot.slane %v531_v26, 1 }
  0xb4   : > { %1041 = vrcp.f32 %v661_v59 }
  0xb5   : > { %v538_v21 = vadd.f32 %v537_v9, %v536_v62  ;;  %v533_v47 = vadd.f32 %v532_v38, %v531_v26 }
  0xb6   : > { %v676_v4 = vpop.permute.xlu1 %675  ;;  %v671_v5 = vpop.permute.xlu0 %670 }
  0xb7   : > { %1043 = vrcp.f32 %v676_v4  ;;  %v539_v33 = vrot.slane %v538_v21, 1 }
  0xb8   : > { %v1032_v11 = vpop.eup %1031  ;;  %1045 = vrcp.f32 %v671_v5 }
  0xb9   : > { %v1034_v15 = vpop.eup %1033  ;;  %v681_v16 = vmul.f32 %v1032_v11, %v498_v2  ;;  %v540_v43 = vadd.f32 %v539_v33, %v538_v21  ;;  %v718_v2 = vld [vmem:[%s1249_s3] sm:$0x3] }
  0xba   : > { %v679_v18 = vmul.f32 %v1034_v15, %v491_v6  ;;  %v723_v4 = vrot.slane %v718_v2, %v722_v1  ;;  %v727_v5 = vrot.slane %v718_v2, %v726_v3 }
  0xbb   : > { %v695_v22 = vpack.c.bf16 %v681_v16, %v681_v16 }
  0xbc   : > { %v1036_v23 = vpop.eup %1035  ;;  %v694_v27 = vpack.c.bf16 %v679_v18, %v679_v18 }
  0xbd   : > { %v1038_v28 = vpop.eup %1037  ;;  %v685_v29 = vmul.f32 %v1036_v23, %v512_v20  ;;  %v739_v34 = vunpack.c.l.b16 %v695_v22 }
  0xbe   : > { %v683_v32 = vmul.f32 %v1038_v28, %v505_v25  ;;  %v738_v24 = vunpack.c.l.b16 %v694_v27 }
  0xbf   : > { %v697_v30 = vpack.c.bf16 %v685_v29, %v685_v29 }
  0xc0   : > { %v1040_v36 = vpop.eup %1039  ;;  %v696_v39 = vpack.c.bf16 %v683_v32, %v683_v32  ;;  %v747_v10 = vsel %vm746_vm1, %v739_v34, %v738_v24 }
  0xc1   : > { %v1042_v35 = vpop.eup %1041  ;;  %v689_v40 = vmul.f32 %v1040_v36, %v526_v31  ;;  %v741_v44 = vunpack.c.l.b16 %v697_v30 }
  0xc2   : > { %v740_v41 = vunpack.c.l.b16 %v696_v39  ;;  %v687_v42 = vmul.f32 %v1042_v35, %v519_v37 }
  0xc3   : > { %v699_v45 = vpack.c.bf16 %v689_v40, %v689_v40 }
  0xc4   : > { %v1044_v46 = vpop.eup %1043  ;;  %v698_v48 = vpack.c.bf16 %v687_v42, %v687_v42  ;;  %v749_v49 = vsel %vm748_vm2, %v740_v41, %v747_v10 }
  0xc5   : > { %v1046_v50 = vpop.eup %1045  ;;  %v693_v51 = vmul.f32 %v1044_v46, %v540_v43  ;;  %v743_v55 = vunpack.c.l.b16 %v699_v45  ;;  %v751_v56 = vsel %vm750_vm3, %v741_v44, %v749_v49 }
  0xc6   : > { %v691_v52 = vmul.f32 %v1046_v50, %v533_v47  ;;  %v742_v53 = vunpack.c.l.b16 %v698_v48 }
  0xc7   : > { %v701_v54 = vpack.c.bf16 %v693_v51, %v693_v51 }
  0xc8   : > { %v700_v57 = vpack.c.bf16 %v691_v52, %v691_v52  ;;  %v753_v58 = vsel %vm752_vm4, %v742_v53, %v751_v56 }
  0xc9   : > { %v745_v59 = vunpack.c.l.b16 %v701_v54  ;;  %v755_v61 = vsel %vm754_vm5, %v743_v55, %v753_v58 }
  0xca   : > { %v744_v60 = vunpack.c.l.b16 %v700_v57 }
  0xcc   : > { %v757_v62 = vsel %vm756_vm6, %v744_v60, %v755_v61 }
  0xcd   : > { %v759_v63 = vsel %vm758_vm7, %v745_v59, %v757_v62 }
  0xce   : > { %v760_v0 = vpack.c.b16 %v759_v63, %v759_v63 }
  0xd0   : > { %875 = vmatmul.mubr.bf16.vlgmr.msra.gmra.mxu0 %v760_v0 }
 0x190   : > { %v876_v6 = vpop.f32.mrf.mxu0 }
 0x191   : > { %v877_v8 = vadd.f32 %v876_v6, %v723_v4 }
 0x192   : > { %v878_v9 = vpop.f32.mrf.mxu0 }
 0x193   : > { %v879_v11 = vadd.f32 %v878_v9, %v727_v5  ;;  %v883_v13 = vmul.f32 %v877_v8, %v877_v8 }
 0x194   : > { %v880_v12 = vpop.f32.mrf.mxu0 }
 0x195   : > { %v884_v14 = vmul.f32 %v879_v11, %v879_v11 }
 0x196   : > { %v881_v15 = vpop.f32.mrf.mxu0 }
 0x197   : > { %v885_v16 = vadd.f32 %v884_v14, %v883_v13 }
 0x199   : > { %886 = vadd.xlane.f32.xlu0 %v885_v16 }
 0x222   : > { %v887_v17 = vpop.xlane.xlu0 %886 }
 0x223   : > { %v888_v18 = vmax.f32 %v887_v17, 1e-24 }
 0x225   : > { %1047 = vrsqrt.f32 %v888_v18 }
 0x232   : > { %v1048_v7 = vpop.eup %1047 }
 0x233   : > { %v890_v20 = vmul.f32 %v1048_v7, %v877_v8  ;;  %v891_v21 = vmul.f32 %v1048_v7, %v879_v11 }
 0x235   : > { %892 = vst [vmem:[%s227_s12] sm:$0xff] %v890_v20  ;;  %893 = vst [vmem:[%s227_s12 + $0x8] sm:$0xff] %v891_v21 }
 0x236 PF: > { %s14_s15 = sadd.s32 1, %s1055_s15  }
 0x237   : > { %p11_p5 = scmp.ge.s32.totalorder %s14_s15, 4  }
 0x239   :  { %13 = sbr.rel (!%p11_p5) target bundleno = 1 (0x1), region = 69 }

</bundles_post_ra>
